<compile_context>
chip_gen: v5e
topology: v5e:2x2
jax: 0.10.0
libtpu: 0.0.40
codegen_flags: <defaults>
</compile_context>

<pallas_src>
import functools

import jax
import jax.numpy as jnp
from jax.experimental import pallas as pl
from jax.experimental.pallas import tpu as pltpu

EPS = 1e-5  # nn.LayerNorm default


def _patch_merging_kernel(x_ref, w_ref, b_ref, o_ref):
    """Fused 2x2-merge + LayerNorm + reduction for one block of row-pairs.

    x_ref: (tr, W, 2C)     tr row-pairs; sublane j < W/2 -> even image row
                           ([x0|x2] channels), j >= W/2 -> odd image row
                           ([x1|x3] channels); lanes = 2C of one column-pair.
    w_ref: (4C, 2Cout)     packed [W_even ; W_odd], LN gamma already folded in.
    b_ref: (1, 2Cout)      beta @ W.
    o_ref: (tr*W/2, 2Cout) merged tokens of this block.
    """
    tr, w_len, c2 = x_ref.shape          # c2 = 2C
    half = w_len // 2                    # W/2 column-pairs per image row
    rows = tr * half                     # merged tokens in this block
    inv_4c = 1.0 / (2.0 * c2)            # 1 / (4C)

    # Static, tile-aligned sublane slices + batch->sublane reshape
    # (tile-exact for W/2 % 8 == 0, e.g. the demo's W=16).
    xe = x_ref[:, :half, :].reshape(rows, c2).astype(jnp.float32)
    xo = x_ref[:, half:, :].reshape(rows, c2).astype(jnp.float32)

    # One-pass LayerNorm stats over the merged 4C channels (two lane chunks).
    s = jnp.sum(xe, axis=-1, keepdims=True) + jnp.sum(xo, axis=-1, keepdims=True)
    s2 = (jnp.sum(xe * xe, axis=-1, keepdims=True)
          + jnp.sum(xo * xo, axis=-1, keepdims=True))
    mu = s * inv_4c
    var = s2 * inv_4c - mu * mu
    inv = jax.lax.rsqrt(var + EPS)

    he = (xe - mu) * inv
    ho = (xo - mu) * inv

    w = w_ref[...].astype(jnp.float32)
    we = w[:c2, :]                       # rows for [x0 | x2] channels
    wo = w[c2:, :]                       # rows for [x1 | x3] channels

    y = (jnp.dot(he, we, preferred_element_type=jnp.float32)
         + jnp.dot(ho, wo, preferred_element_type=jnp.float32)
         + b_ref[...].astype(jnp.float32))
    o_ref[...] = y.astype(o_ref.dtype)


def patch_merging(x, params, *, input_resolution, block_row_pairs=None,
                  out_dtype=None):
    """PatchMerging forward.

    x:      (B, L, C) with L = H*W, H and W even.
    params: dict with
        "gamma", "beta": (4C,) LayerNorm affine params
        "w":             (4C, 2C) reduction weight (== nn.Linear.weight.T)
    """
    H, W = input_resolution
    B, L, C = x.shape
    assert L == H * W, "input feature has wrong size"
    assert H % 2 == 0 and W % 2 == 0, f"x size ({H}*{W}) are not even."

    c2 = 2 * C                     # lane width of one column-pair
    c_out = params["w"].shape[1]   # 2*dim output channels
    n_rp = B * (H // 2)            # row-pairs
    half_w = W // 2                # column-pairs per image row
    n_tok = n_rp * half_w          # merged tokens
    out_dtype = x.dtype if out_dtype is None else out_dtype

    # ---- free (row-major) reshape: no gather, no transpose, no HBM copy ----
    x3 = x.reshape(n_rp, W, c2)

    # ---- fold LayerNorm affine into the weight; permute rows to the natural
    #      [even-row (x0|x2) ; odd-row (x1|x3)] order ----------------------
    # (tiny; in production fold once at parameter-prep time)
    gw = params["gamma"][:, None].astype(jnp.float32) * params["w"].astype(jnp.float32)
    w_even = jnp.concatenate([gw[0:C], gw[2 * C:3 * C]], axis=0)     # (2C, 2Cout)
    w_odd = jnp.concatenate([gw[C:2 * C], gw[3 * C:4 * C]], axis=0)  # (2C, 2Cout)
    w_packed = jnp.concatenate([w_even, w_odd], axis=0)              # (4C, 2Cout)
    bias = (params["beta"].astype(jnp.float32) @ params["w"].astype(jnp.float32))[None, :]

    # ---- block size: roofline-class tiles (~2048 merged tokens per step) ---
    if block_row_pairs is None:
        tr = max(1, 2048 // max(1, half_w))
    else:
        tr = block_row_pairs
    tr = min(tr, n_rp)

    grid = (pl.cdiv(n_rp, tr),)

    # ---- explicit VMEM budget (v5e scoped default is only 16 MiB) ----------
    in_block = tr * W * c2 * x.dtype.itemsize
    out_block = tr * half_w * c_out * jnp.dtype(out_dtype).itemsize
    scratch = 8 * tr * half_w * c2 * 4            # f32 intermediates, generous
    params_bytes = (4 * C + 1) * c_out * 4
    vmem_limit = min(64 << 20,
                     max(32 << 20, 2 * (in_block + out_block) + scratch
                         + params_bytes + (2 << 20)))

    out = pl.pallas_call(
        _patch_merging_kernel,
        out_shape=jax.ShapeDtypeStruct((n_tok, c_out), out_dtype),
        grid_spec=pltpu.PrefetchScalarGridSpec(
            num_scalar_prefetch=0,
            grid=grid,
            in_specs=[
                pl.BlockSpec((tr, W, c2), lambda i: (i, 0, 0)),   # row-pair tile
                pl.BlockSpec((4 * C, c_out), lambda i: (0, 0)),   # packed weight
                pl.BlockSpec((1, c_out), lambda i: (0, 0)),       # beta @ w
            ],
            out_specs=pl.BlockSpec((tr * half_w, c_out), lambda i: (i, 0)),
        ),
        compiler_params=pltpu.CompilerParams(
            dimension_semantics=("parallel",),
            vmem_limit_bytes=int(vmem_limit)),
    )(x3, w_packed, bias)

    return out.reshape(B, (H // 2) * (W // 2), c_out)


def patch_merging_ref(x, params, *, input_resolution):
    """Pure-JAX f32 reference (mirrors the PyTorch forward)."""
    H, W = input_resolution
    B, L, C = x.shape
    xr = x.reshape(B, H, W, C).astype(jnp.float32)
    x0 = xr[:, 0::2, 0::2, :]
    x1 = xr[:, 1::2, 0::2, :]
    x2 = xr[:, 0::2, 1::2, :]
    x3 = xr[:, 1::2, 1::2, :]
    xm = jnp.concatenate([x0, x1, x2, x3], axis=-1).reshape(B, -1, 4 * C)
    mu = jnp.mean(xm, axis=-1, keepdims=True)
    var = jnp.mean(jnp.square(xm - mu), axis=-1, keepdims=True)
    h = (xm - mu) * jax.lax.rsqrt(var + EPS) * params["gamma"] + params["beta"]
    return h @ params["w"]


if __name__ == "__main__":
    # Small config: dim=64 so 2*dim=128 (lane width of one column-pair and of
    # the output) is lane-dense; (H, W) = (16, 16), B = 2.
    dim = 64
    H_res, W_res = 16, 16
    B = 2
    L = H_res * W_res  # 256 -> 128 merged tokens, 16 row-pairs

    key = jax.random.PRNGKey(0)
    kx, kg, kb, kw = jax.random.split(key, 4)
    x = jax.random.normal(kx, (B, L, dim), jnp.float32)
    params = {
        "gamma": 1.0 + 0.1 * jax.random.normal(kg, (4 * dim,), jnp.float32),
        "beta": 0.1 * jax.random.normal(kb, (4 * dim,), jnp.float32),
        "w": 0.02 * jax.random.normal(kw, (4 * dim, 2 * dim), jnp.float32),
    }

    # block_row_pairs=8 -> 2 "parallel" grid steps for the toy size (exercises
    # the pipeline); at realistic sizes the default heuristic picks
    # roofline-class tiles (~2048 merged tokens per step).
    fwd = jax.jit(functools.partial(patch_merging,
                                    input_resolution=(H_res, W_res),
                                    block_row_pairs=8))
    out = jax.block_until_ready(fwd(x, params))

    ref = patch_merging_ref(x, params, input_resolution=(H_res, W_res))
    assert out.shape == (B, L // 4, 2 * dim)
    # Full-f32 compute path -> tight tolerance vs the f32 reference.
    assert jnp.allclose(out, ref, atol=1e-4, rtol=1e-4), \
        float(jnp.max(jnp.abs(out - ref)))

    print("KERNEL_OK")
</pallas_src>

<mosaic_0001>
module attributes {stable_mosaic.version = 11 : i64} {
  func.func @_patch_merging_kernel(%arg0: i32, %arg1: memref<8x16x128xf32, #tpu.memory_space<vmem>>, %arg2: memref<256x128xf32, #tpu.memory_space<vmem>>, %arg3: memref<1x128xf32, #tpu.memory_space<vmem>>, %arg4: memref<64x128xf32, #tpu.memory_space<vmem>>) attributes {dimension_semantics = [#tpu.dimension_semantics<parallel>], iteration_bounds = array<i64: 2>, scalar_prefetch = 0 : i64, scratch_operands = 0 : i64, tpu.core_type = #tpu.core_type<tc>, window_params = [{transform_indices = @transform_0, window_bounds = array<i64: 8, 16, 128>}, {pipeline_mode = #tpu.pipeline_mode<synchronous>, transform_indices = @transform_1, window_bounds = array<i64: 256, 128>}, {pipeline_mode = #tpu.pipeline_mode<synchronous>, transform_indices = @transform_2, window_bounds = array<i64: 1, 128>}, {transform_indices = @transform_3, window_bounds = array<i64: 64, 128>}]} {
    %c0 = arith.constant 0 : index
    %c0_0 = arith.constant 0 : index
    %c0_1 = arith.constant 0 : index
    %0 = vector.load %arg1[%c0, %c0_0, %c0_1] : memref<8x16x128xf32, #tpu.memory_space<vmem>>, vector<8x8x128xf32>
    %1 = vector.shape_cast %0 : vector<8x8x128xf32> to vector<64x128xf32>
    %c0_2 = arith.constant 0 : index
    %c8 = arith.constant 8 : index
    %c0_3 = arith.constant 0 : index
    %2 = vector.load %arg1[%c0_2, %c8, %c0_3] : memref<8x16x128xf32, #tpu.memory_space<vmem>>, vector<8x8x128xf32>
    %3 = vector.shape_cast %2 : vector<8x8x128xf32> to vector<64x128xf32>
    %cst = arith.constant dense<0.000000e+00> : vector<64xf32>
    %4 = vector.multi_reduction <add>, %1, %cst [1] : vector<64x128xf32> to vector<64xf32>
    %5 = vector.shape_cast %4 : vector<64xf32> to vector<64x1xf32>
    %cst_4 = arith.constant dense<0.000000e+00> : vector<64xf32>
    %6 = vector.multi_reduction <add>, %3, %cst_4 [1] : vector<64x128xf32> to vector<64xf32>
    %7 = vector.shape_cast %6 : vector<64xf32> to vector<64x1xf32>
    %8 = arith.addf %5, %7 : vector<64x1xf32>
    %9 = arith.mulf %1, %1 : vector<64x128xf32>
    %cst_5 = arith.constant dense<0.000000e+00> : vector<64xf32>
    %10 = vector.multi_reduction <add>, %9, %cst_5 [1] : vector<64x128xf32> to vector<64xf32>
    %11 = vector.shape_cast %10 : vector<64xf32> to vector<64x1xf32>
    %12 = arith.mulf %3, %3 : vector<64x128xf32>
    %cst_6 = arith.constant dense<0.000000e+00> : vector<64xf32>
    %13 = vector.multi_reduction <add>, %12, %cst_6 [1] : vector<64x128xf32> to vector<64xf32>
    %14 = vector.shape_cast %13 : vector<64xf32> to vector<64x1xf32>
    %15 = arith.addf %11, %14 : vector<64x1xf32>
    %cst_7 = arith.constant 3.906250e-03 : f32
    %16 = vector.broadcast %cst_7 : f32 to vector<64x1xf32>
    %17 = arith.mulf %8, %16 : vector<64x1xf32>
    %cst_8 = arith.constant 3.906250e-03 : f32
    %18 = vector.broadcast %cst_8 : f32 to vector<64x1xf32>
    %19 = arith.mulf %15, %18 : vector<64x1xf32>
    %20 = arith.mulf %17, %17 : vector<64x1xf32>
    %21 = arith.subf %19, %20 : vector<64x1xf32>
    %cst_9 = arith.constant 9.99999974E-6 : f32
    %22 = vector.broadcast %cst_9 : f32 to vector<64x1xf32>
    %23 = arith.addf %21, %22 : vector<64x1xf32>
    %24 = math.rsqrt %23 : vector<64x1xf32>
    %25 = vector.broadcast %17 : vector<64x1xf32> to vector<64x128xf32>
    %26 = arith.subf %1, %25 : vector<64x128xf32>
    %27 = vector.broadcast %24 : vector<64x1xf32> to vector<64x128xf32>
    %28 = arith.mulf %26, %27 : vector<64x128xf32>
    %29 = vector.broadcast %17 : vector<64x1xf32> to vector<64x128xf32>
    %30 = arith.subf %3, %29 : vector<64x128xf32>
    %31 = vector.broadcast %24 : vector<64x1xf32> to vector<64x128xf32>
    %32 = arith.mulf %30, %31 : vector<64x128xf32>
    %c0_10 = arith.constant 0 : index
    %c0_11 = arith.constant 0 : index
    %33 = vector.load %arg2[%c0_10, %c0_11] : memref<256x128xf32, #tpu.memory_space<vmem>>, vector<256x128xf32>
    %34 = vector.extract_strided_slice %33 {offsets = [0, 0], sizes = [128, 128], strides = [1, 1]} : vector<256x128xf32> to vector<128x128xf32>
    %35 = vector.extract_strided_slice %33 {offsets = [128, 0], sizes = [128, 128], strides = [1, 1]} : vector<256x128xf32> to vector<128x128xf32>
    %cst_12 = arith.constant dense<0.000000e+00> : vector<64x128xf32>
    %36 = tpu.matmul %28, %34, %cst_12 {dimension_numbers = #tpu.dot_dimension_numbers<[1], [0], [0], [1], [0, 0, 1, 1], [], []>} : vector<64x128xf32>, vector<128x128xf32>, vector<64x128xf32> -> vector<64x128xf32>
    %cst_13 = arith.constant dense<0.000000e+00> : vector<64x128xf32>
    %37 = tpu.matmul %32, %35, %cst_13 {dimension_numbers = #tpu.dot_dimension_numbers<[1], [0], [0], [1], [0, 0, 1, 1], [], []>} : vector<64x128xf32>, vector<128x128xf32>, vector<64x128xf32> -> vector<64x128xf32>
    %38 = arith.addf %36, %37 : vector<64x128xf32>
    %c0_14 = arith.constant 0 : index
    %c0_15 = arith.constant 0 : index
    %39 = vector.load %arg3[%c0_14, %c0_15] : memref<1x128xf32, #tpu.memory_space<vmem>>, vector<1x128xf32>
    %40 = vector.broadcast %39 : vector<1x128xf32> to vector<64x128xf32>
    %41 = arith.addf %38, %40 : vector<64x128xf32>
    %c0_16 = arith.constant 0 : index
    %c0_17 = arith.constant 0 : index
    %42 = vector.load %arg4[%c0_16, %c0_17] : memref<64x128xf32, #tpu.memory_space<vmem>>, vector<64x128xf32>
    tpu.vector_store %arg4[%c0_16, %c0_17], %41 {strides = array<i32>} : memref<64x128xf32, #tpu.memory_space<vmem>>, vector<64x128xf32>,
    return
  }
  func.func @transform_0(%arg0: i32) -> (i32, i32, i32) {
    %c0_i32 = arith.constant 0 : i32
    %c0_i32_0 = arith.constant 0 : i32
    %c0_i32_1 = arith.constant 0 : i32
    return %arg0, %c0_i32, %c0_i32_0 : i32, i32, i32
  }
  func.func @transform_1(%arg0: i32) -> (i32, i32) {
    %c0_i32 = arith.constant 0 : i32
    %c0_i32_0 = arith.constant 0 : i32
    %c0_i32_1 = arith.constant 0 : i32
    return %c0_i32, %c0_i32_0 : i32, i32
  }
  func.func @transform_2(%arg0: i32) -> (i32, i32) {
    %c0_i32 = arith.constant 0 : i32
    %c0_i32_0 = arith.constant 0 : i32
    %c0_i32_1 = arith.constant 0 : i32
    return %c0_i32, %c0_i32_0 : i32, i32
  }
  func.func @transform_3(%arg0: i32) -> (i32, i32) {
    %c0_i32 = arith.constant 0 : i32
    %c0_i32_0 = arith.constant 0 : i32
    return %arg0, %c0_i32 : i32, i32
  }
}

</mosaic_0001>

<bundles_post_ra>
// kernel: patch_merging.1
= control target key start
LH: loop header
LB: loop body
LE: loop exit
PB: predicated region body
PF: predicated region fallthrough
CT: control target
= control target key end

     0   :  { %8 = vsyncpa [#allocation3], 0  ;;  %s1191_s0 = inlined_call_operand.vmem [shape: f32[16,16,128], index: 0, kind: input, shape index: {}]   ;;  %s1192_s1 = inlined_call_operand.vmem [shape: f32[256,128], index: 1, kind: input, shape index: {}]   ;;  %s1193_s2 = inlined_call_operand.vmem [shape: f32[1,128], index: 2, kind: input, shape index: {}]   ;;  %s1194_s3 = inlined_call_operand.hbm [shape: f32[128,128], index: 3, kind: output, shape index: {}]  }
   0x1   :  { %10 = vsyncpa [#allocation3 + $0x1], 0  ;;  %s842_s12 = smov 0   ;;  %s844_s13 = smov 0  }
   0x2   :  { %s846_s14 = smov 0   ;;  %s848_s15 = smov 0  }
   0x3 LB: > { %s863_s16 = sadd.s32 4294967295, %s818_s15   ;;  %s651_s17 = sadd.s32 4294967294, %s818_s15   ;;  %s818_s15 = sphi %s848_s15, %s1200_s15   ;;  %s814_s14 = sphi %s846_s14, %s1199_s14   ;;  %s810_s13 = sphi %s844_s13, %s1198_s13   ;;  %s806_s12 = sphi %s842_s12, %s1197_s12  }
   0x4   : > { %s867_s18 = sadd.s32 1, %s818_s15   ;;  %s91_s19 = sadd.s32 1, %s814_s14 }
   0x5   : > { %s88_s20 = ssub.s32 %s818_s15, %s867_s18  ;;  %p101_p0 = scmp.ne.s32.totalorder %s814_s14, %s810_s13 }
   0x6   : > { %p89_p1 = scmp.eq.s32.totalorder %s88_s20, 0  ;;  %p102_p2 = scmp.eq.s32.totalorder %s863_s16, 1 }
   0x7   : > { %p107_p3 = scmp.ne.s32.totalorder %s810_s13, %s806_s12  ;;  %p108_p4 = scmp.eq.s32.totalorder %s651_s17, 1 }
   0x8   : > { %s878_s21 = scalar_select %p89_p1, %s814_s14, %s91_s19  }
   0x9   : > { %p880_p5 = por %p102_p2, %p101_p0  ;;  %p884_p6 = por %p108_p4, %p107_p3 }
   0xa   : > { %p654_p7 = scmp.ge.s32.totalorder %s818_s15, 1  ;;  %p142_p8 = scmp.lt.s32.totalorder %s818_s15, 3 }
   0xc   : > { %p143_p9 = pnand %p654_p7, %p142_p8 }
   0xd   : > { %s656_s24 = sshll.u32 (!%p143_p9), %s863_s16, 3  ;;  %s164_s17 = sand.u32 (!%p143_p9), 1, %s810_s13  }
   0xe   : > { %146 = sbr.rel (%p143_p9) target bundleno = 383 (0x17f), region = 32  ;;  %p168_p10 = scmp.lt.s32.totalorder (!%p143_p9), %s656_s24, 15 }
   0xf   : > { %s655_s19 = sshll.u32 (!%p143_p9), %s164_s17, 6  ;;  %s665_s26 = sshll.u32 (!%p143_p9), %s863_s16, 6 }
  0x10   : > { %s585_s29 = scalar_lea.hbm (!%p143_p9), %s1194_s3, %s665_s26  ;;  %s574_s16 = scalar_lea.sflag (!%p143_p9), [#allocation3], %s164_s17 }
  0x11   : > { %s588_s4 = sshll.u32 (!%p143_p9), %s585_s29, 4  ;;  %s776_s9 = scalar_lea.hbm (!%p143_p9), %s1194_s3, 128  ;;  %s589_s4 = int_to_ptr.hbm [resolvable:$true] %s588_s4 }
  0x12   : > { %s770_s5 = sshra.s32 (!%p143_p9), %s589_s4, 4  ;;  %s771_s5 = int_to_ptr.hbm [resolvable:$true] %s770_s5 }
  0x13   : > { %s1202_s24 = smov (!%p168_p10, %s656_s24), 15  ;;  %v470_v32 = vld [vmem:[%s1192_s1 + $0xf8] sm:$0xff]  ;;  %v469_v34 = vld [vmem:[%s1192_s1 + $0xf0] sm:$0xff]  ;;  %v468_v36 = vld [vmem:[%s1192_s1 + $0xe8] sm:$0xff]  ;;  %s772_s6 = scalar_lea.hbm %s771_s5, 64 }
  0x14   : > { %s664_s25 = sshll.u32 %s1202_s24, 4  ;;  %v454_v33 = vld [vmem:[%s1192_s1 + $0x78] sm:$0xff]  ;;  %666 = vmatpush.msra.mxu2 %v470_v32  ;;  %471 = vmatpush.msra.mxu0 %v470_v32  ;;  %v453_v35 = vld [vmem:[%s1192_s1 + $0x70] sm:$0xff]  ;;  %v452_v37 = vld [vmem:[%s1192_s1 + $0x68] sm:$0xff]  ;;  %p773_p11 = scmp.ne.s32.totalorder %s771_s5, %s772_s6 }
  0x15   : > { %s894_s28 = scalar_lea.vmem %s1191_s0, %s664_s25  ;;  %682 = vmatpush.msra.mxu3 %v454_v33  ;;  %512 = vmatpush.msra.mxu1 %v454_v33  ;;  %v467_v38 = vld [vmem:[%s1192_s1 + $0xe0] sm:$0xff]  ;;  %v466_v40 = vld [vmem:[%s1192_s1 + $0xd8] sm:$0xff]  ;;  %v465_v42 = vld [vmem:[%s1192_s1 + $0xd0] sm:$0xff]  ;;  %s1147_s25 = scalar_lea.vmem [#allocation2], %s655_s19 }
  0x16   : > { %v897_v0 = vld [vmem:[%s894_s28 + $0x40] sm:$0xff]  ;;  %v907_v3 = vld [vmem:[%s894_s28 + $0x48] sm:$0xff]  ;;  %v919_v7 = vld [vmem:[%s894_s28 + $0x50] sm:$0xff]  ;;  %667 = vmatpush.msra.mxu2 %v469_v34  ;;  %472 = vmatpush.msra.mxu0 %v469_v34  ;;  %s586_s30 = sshll.u32 %s1147_s25, 4  ;;  %p774_p12 = pnand %p773_p11, %p880_p5  ;;  %s587_s30 = int_to_ptr.vmem [resolvable:$true] %s586_s30 }
  0x17   : > { %v900_v1 = vld [vmem:[%s894_s28] sm:$0xff]  ;;  %199 = vadd.xlane.f32.xlu0 %v897_v0  ;;  %v235_v2 = vmul.f32 %v897_v0, %v897_v0  ;;  %v910_v4 = vld [vmem:[%s894_s28 + $0x8] sm:$0xff]  ;;  %v259_v5 = vmul.f32 %v907_v3, %v907_v3  ;;  %v922_v8 = vld [vmem:[%s894_s28 + $0x58] sm:$0xff]  ;;  %v236_v11 = vmul.f32 %v919_v7, %v919_v7  ;;  %683 = vmatpush.msra.mxu3 %v453_v35  ;;  %p777_p0 = scmp.lt.s32.totalorder %s771_s5, %s1194_s3  ;;  %p778_p1 = scmp.lt.s32.totalorder %s776_s9, %s772_s6 }
  0x18   : > { %191 = vadd.xlane.f32.xlu2 %v900_v1  ;;  %v231_v6 = vmul.f32 %v900_v1, %v900_v1  ;;  %v255_v9 = vmul.f32 %v910_v4, %v910_v4  ;;  %v260_v10 = vmul.f32 %v922_v8, %v922_v8  ;;  %v933_v12 = vld [vmem:[%s894_s28 + $0x10] sm:$0xff]  ;;  %v936_v13 = vld [vmem:[%s894_s28 + $0x60] sm:$0xff]  ;;  %v939_v14 = vld [vmem:[%s894_s28 + $0x18] sm:$0xff]  ;;  %513 = vmatpush.msra.mxu1 %v453_v35  ;;  %p775_p13 = pneg %p774_p12 }
  0x19   : > { %247 = vadd.xlane.f32.xlu1 %v235_v2  ;;  %v256_v15 = vmul.f32 %v939_v14, %v939_v14  ;;  %v947_v16 = vld [vmem:[%s894_s28 + $0x68] sm:$0xff]  ;;  %v232_v17 = vmul.f32 %v933_v12, %v933_v12  ;;  %v237_v18 = vmul.f32 %v936_v13, %v936_v13  ;;  %v955_v19 = vld [vmem:[%s894_s28 + $0x20] sm:$0xff]  ;;  %v964_v22 = vld [vmem:[%s894_s28 + $0x78] sm:$0xff]  ;;  %668 = vmatpush.msra.mxu2 %v468_v36  ;;  %p779_p2 = por %p778_p1, %p777_p0 }
  0x1a   : > { %v261_v20 = vmul.f32 %v947_v16, %v947_v16  ;;  %v961_v21 = vld [vmem:[%s894_s28 + $0x28] sm:$0xff]  ;;  %v967_v23 = vld [vmem:[%s894_s28 + $0x70] sm:$0xff]  ;;  %v233_v24 = vmul.f32 %v955_v19, %v955_v19  ;;  %v262_v27 = vmul.f32 %v964_v22, %v964_v22  ;;  %v981_v28 = vld [vmem:[%s894_s28 + $0x38] sm:$0xff]  ;;  %684 = vmatpush.msra.mxu3 %v452_v37  ;;  %473 = vmatpush.msra.mxu0 %v468_v36 }
  0x1b   : > { %v238_v25 = vmul.f32 %v967_v23, %v967_v23  ;;  %v257_v26 = vmul.f32 %v961_v21, %v961_v21  ;;  %v984_v29 = vld [vmem:[%s894_s28 + $0x30] sm:$0xff]  ;;  %v258_v31 = vmul.f32 %v981_v28, %v981_v28  ;;  %v451_v39 = vld [vmem:[%s1192_s1 + $0x60] sm:$0xff]  ;;  %514 = vmatpush.msra.mxu1 %v452_v37  ;;  %669 = vmatpush.msra.mxu2 %v467_v38  ;;  %v450_v41 = vld [vmem:[%s1192_s1 + $0x58] sm:$0xff]  ;;  %p780_p3 = pnand %p779_p2, %p775_p13 }
  0x1c   : > { %v234_v30 = vmul.f32 %v984_v29, %v984_v29  ;;  %685 = vmatpush.msra.mxu3 %v451_v39  ;;  %474 = vmatpush.msra.mxu0 %v467_v38  ;;  %v449_v43 = vld [vmem:[%s1192_s1 + $0x50] sm:$0xff]  ;;  %v464_v44 = vld [vmem:[%s1192_s1 + $0xc8] sm:$0xff]  ;;  %v463_v46 = vld [vmem:[%s1192_s1 + $0xc0] sm:$0xff] }
  0x1d   : > { %515 = vmatpush.msra.mxu1 %v451_v39  ;;  %670 = vmatpush.msra.mxu2 %v466_v40  ;;  %v448_v45 = vld [vmem:[%s1192_s1 + $0x48] sm:$0xff]  ;;  %v447_v47 = vld [vmem:[%s1192_s1 + $0x40] sm:$0xff]  ;;  %v462_v48 = vld [vmem:[%s1192_s1 + $0xb8] sm:$0xff] }
  0x1e   : > { %686 = vmatpush.msra.mxu3 %v450_v41  ;;  %475 = vmatpush.msra.mxu0 %v466_v40  ;;  %v446_v49 = vld [vmem:[%s1192_s1 + $0x38] sm:$0xff]  ;;  %v461_v50 = vld [vmem:[%s1192_s1 + $0xb0] sm:$0xff]  ;;  %v460_v52 = vld [vmem:[%s1192_s1 + $0xa8] sm:$0xff] }
  0x1f   : > { %215 = vadd.xlane.f32.xlu0 %v907_v3  ;;  %516 = vmatpush.msra.mxu1 %v450_v41  ;;  %v445_v51 = vld [vmem:[%s1192_s1 + $0x30] sm:$0xff]  ;;  %v444_v53 = vld [vmem:[%s1192_s1 + $0x28] sm:$0xff]  ;;  %v459_v54 = vld [vmem:[%s1192_s1 + $0xa0] sm:$0xff] }
  0x20   : > { %207 = vadd.xlane.f32.xlu2 %v910_v4  ;;  %671 = vmatpush.msra.mxu2 %v465_v42  ;;  %v443_v55 = vld [vmem:[%s1192_s1 + $0x20] sm:$0xff]  ;;  %v458_v56 = vld [vmem:[%s1192_s1 + $0x98] sm:$0xff]  ;;  %v457_v60 = vld [vmem:[%s1192_s1 + $0x90] sm:$0xff] }
  0x21   : > { %271 = vadd.xlane.f32.xlu1 %v259_v5  ;;  %687 = vmatpush.msra.mxu3 %v449_v43  ;;  %v442_v57 = vld [vmem:[%s1192_s1 + $0x18] sm:$0xff]  ;;  %v441_v61 = vld [vmem:[%s1192_s1 + $0x10] sm:$0xff]  ;;  %v456_v63 = vld [vmem:[%s1192_s1 + $0x88] sm:$0xff] }
  0x22   : > { %476 = vmatpush.msra.mxu0 %v465_v42  ;;  %517 = vmatpush.msra.mxu1 %v449_v43  ;;  %v440_v2 = vld [vmem:[%s1192_s1 + $0x8] sm:$0xff]  ;;  %v455_v5 = vld [vmem:[%s1192_s1 + $0x80] sm:$0xff] }
  0x23   : > { %672 = vmatpush.msra.mxu2 %v464_v44  ;;  %688 = vmatpush.msra.mxu3 %v448_v45 }
  0x24   : > { %477 = vmatpush.msra.mxu0 %v464_v44  ;;  %518 = vmatpush.msra.mxu1 %v448_v45 }
  0x25   : > { %673 = vmatpush.msra.mxu2 %v463_v46  ;;  %689 = vmatpush.msra.mxu3 %v447_v47 }
  0x26   : > { %478 = vmatpush.msra.mxu0 %v463_v46  ;;  %519 = vmatpush.msra.mxu1 %v447_v47 }
  0x27   : > { %201 = vadd.xlane.f32.xlu0 %v919_v7  ;;  %674 = vmatpush.msra.mxu2 %v462_v48 }
  0x28   : > { %239 = vadd.xlane.f32.xlu2 %v231_v6  ;;  %690 = vmatpush.msra.mxu3 %v446_v49  ;;  %v439_v6 = vld [vmem:[%s1192_s1] sm:$0xff] }
  0x29   : > { %217 = vadd.xlane.f32.xlu1 %v922_v8  ;;  %479 = vmatpush.msra.mxu0 %v462_v48 }
  0x2a   : > { %520 = vmatpush.msra.mxu1 %v446_v49  ;;  %675 = vmatpush.msra.mxu2 %v461_v50 }
  0x2b   : > { %691 = vmatpush.msra.mxu3 %v445_v51  ;;  %480 = vmatpush.msra.mxu0 %v461_v50 }
  0x2c   : > { %521 = vmatpush.msra.mxu1 %v445_v51  ;;  %676 = vmatpush.msra.mxu2 %v460_v52 }
  0x2d   : > { %692 = vmatpush.msra.mxu3 %v444_v53  ;;  %481 = vmatpush.msra.mxu0 %v460_v52 }
  0x2e   : > { %522 = vmatpush.msra.mxu1 %v444_v53  ;;  %677 = vmatpush.msra.mxu2 %v459_v54 }
  0x2f   : > { %263 = vadd.xlane.f32.xlu0 %v255_v9  ;;  %693 = vmatpush.msra.mxu3 %v443_v55 }
  0x30   : > { %273 = vadd.xlane.f32.xlu2 %v260_v10  ;;  %482 = vmatpush.msra.mxu0 %v459_v54 }
  0x31   : > { %249 = vadd.xlane.f32.xlu1 %v236_v11  ;;  %523 = vmatpush.msra.mxu1 %v443_v55 }
  0x32   : > { %678 = vmatpush.msra.mxu2 %v458_v56  ;;  %694 = vmatpush.msra.mxu3 %v442_v57 }
  0x33   : > { %483 = vmatpush.msra.mxu0 %v458_v56  ;;  %524 = vmatpush.msra.mxu1 %v442_v57 }
  0x34   : > { %679 = vmatpush.msra.mxu2 %v457_v60  ;;  %695 = vmatpush.msra.mxu3 %v441_v61 }
  0x35   : > { %484 = vmatpush.msra.mxu0 %v457_v60  ;;  %525 = vmatpush.msra.mxu1 %v441_v61 }
  0x36   : > { %680 = vmatpush.msra.mxu2 %v456_v63  ;;  %696 = vmatpush.msra.mxu3 %v440_v2 }
  0x37   : > { %193 = vadd.xlane.f32.xlu0 %v933_v12  ;;  %485 = vmatpush.msra.mxu0 %v456_v63 }
  0x38   : > { %203 = vadd.xlane.f32.xlu2 %v936_v13  ;;  %526 = vmatpush.msra.mxu1 %v440_v2 }
  0x39   : > { %209 = vadd.xlane.f32.xlu1 %v939_v14  ;;  %681 = vmatpush.msra.mxu2 %v455_v5 }
  0x3a   : > { %697 = vmatpush.msra.mxu3 %v439_v6  ;;  %486 = vmatpush.msra.mxu0 %v455_v5 }
  0x3b   : > { %527 = vmatpush.msra.mxu1 %v439_v6 }
  0x3f   : > { %219 = vadd.xlane.f32.xlu0 %v947_v16 }
  0x40   : > { %265 = vadd.xlane.f32.xlu2 %v256_v15 }
  0x41   : > { %241 = vadd.xlane.f32.xlu1 %v232_v17 }
  0x47   : > { %251 = vadd.xlane.f32.xlu0 %v237_v18 }
  0x48   : > { %195 = vadd.xlane.f32.xlu2 %v955_v19 }
  0x49   : > { %275 = vadd.xlane.f32.xlu1 %v261_v20 }
  0x4f   : > { %211 = vadd.xlane.f32.xlu0 %v961_v21 }
  0x50   : > { %221 = vadd.xlane.f32.xlu2 %v964_v22 }
  0x51   : > { %205 = vadd.xlane.f32.xlu1 %v967_v23 }
  0x57   : > { %243 = vadd.xlane.f32.xlu0 %v233_v24 }
  0x58   : > { %253 = vadd.xlane.f32.xlu2 %v238_v25 }
  0x59   : > { %267 = vadd.xlane.f32.xlu1 %v257_v26 }
  0x5f   : > { %277 = vadd.xlane.f32.xlu0 %v262_v27 }
  0x60   : > { %213 = vadd.xlane.f32.xlu2 %v981_v28 }
  0x61   : > { %197 = vadd.xlane.f32.xlu1 %v984_v29 }
  0x67   : > { %245 = vadd.xlane.f32.xlu0 %v234_v30 }
  0x69   : > { %269 = vadd.xlane.f32.xlu1 %v258_v31 }
  0x8a   : > { %v200_v58 = vpop.xlane.xlu0 %199 }
  0x8b   : > { %v192_v59 = vpop.xlane.xlu2 %191 }
  0x8c   : > { %v248_v62 = vpop.xlane.xlu1 %247 }
  0x92   : > { %v216_v9 = vpop.xlane.xlu0 %215 }
  0x93   : > { %v208_v10 = vpop.xlane.xlu2 %207  ;;  %v227_v11 = vadd.f32 %v216_v9, %v200_v58 }
  0x94   : > { %v272_v15 = vpop.xlane.xlu1 %271  ;;  %v223_v32 = vadd.f32 %v208_v10, %v192_v59 }
  0x95   : > { %v291_v17 = vmul.f32 0.00390625, %v227_v11  ;;  %v283_v18 = vadd.f32 %v272_v15, %v248_v62 }
  0x96   : > { %v1088_v34 = vmul.f32 0.00390625, %v223_v32 }
  0x97   : > { %v307_v20 = vmul.f32 %v291_v17, %v291_v17  ;;  %v299_v24 = vmul.f32 0.00390625, %v283_v18  ;;  %v427_v58 = vsub.f32 %v907_v3, %v291_v17  ;;  %v411_v59 = vsub.f32 %v897_v0, %v291_v17 }
  0x98   : > { %v303_v43 = vmul.f32 %v1088_v34, %v1088_v34  ;;  %v423_v32 = vsub.f32 %v910_v4, %v1088_v34 }
  0x99   : > { %v315_v25 = vsub.f32 %v299_v24, %v307_v20 }
  0x9a   : > { %v202_v26 = vpop.xlane.xlu0 %201 }
  0x9b   : > { %v240_v27 = vpop.xlane.xlu2 %239  ;;  %v323_v30 = vadd.f32 1e-05, %v315_v25 }
  0x9c   : > { %v218_v31 = vpop.xlane.xlu1 %217 }
  0x9d   : > { %740 = vrsqrt.f32 %v323_v30  ;;  %v228_v33 = vadd.f32 %v218_v31, %v202_v26  ;;  %vm373_vm1 = vweird.f32 %v323_v30 }
  0x9f   : > { %v1090_v38 = vmul.f32 0.00390625, %v228_v33 }
  0xa1   : > { %v308_v47 = vmul.f32 %v1090_v38, %v1090_v38  ;;  %v412_v4 = vsub.f32 %v919_v7, %v1090_v38 }
  0xa2   : > { %v264_v35 = vpop.xlane.xlu0 %263 }
  0xa3   : > { %v274_v36 = vpop.xlane.xlu2 %273  ;;  %v741_v37 = vpop.eup %740  ;;  %v279_v39 = vadd.f32 %v264_v35, %v240_v27 }
  0xa4   : > { %v368_v40 = vmul.f32 %v741_v37, %v323_v30  ;;  %v250_v41 = vpop.xlane.xlu1 %249  ;;  %vm374_vm0 = vweird.f32 %v741_v37 }
  0xa5   : > { %v295_v42 = vmul.f32 0.00390625, %v279_v39  ;;  %v284_v44 = vadd.f32 %v274_v36, %v250_v41  ;;  %vm375_vm2 = vmor %vm373_vm1, %vm374_vm0  ;;  %v407_v41 = vsub.f32 %v900_v1, %v1088_v34 }
  0xa6   : > { %v369_v45 = vmul.f32 %v741_v37, %v368_v40 }
  0xa7   : > { %v311_v46 = vsub.f32 %v295_v42, %v303_v43  ;;  %v300_v48 = vmul.f32 0.00390625, %v284_v44  ;;  %v428_v42 = vsub.f32 %v922_v8, %v1090_v38 }
  0xa8   : > { %v370_v49 = vmul.f32 0.5, %v369_v45 }
  0xa9   : > { %v319_v50 = vadd.f32 1e-05, %v311_v46  ;;  %v316_v51 = vsub.f32 %v300_v48, %v308_v47 }
  0xaa   : > { %v194_v52 = vpop.xlane.xlu0 %193  ;;  %v371_v54 = vsub.f32 1.5, %v370_v49 }
  0xab   : > { %v204_v53 = vpop.xlane.xlu2 %203  ;;  %742 = vrsqrt.f32 %v319_v50  ;;  %v324_v55 = vadd.f32 1e-05, %v316_v51  ;;  %vm333_vm4 = vweird.f32 %v319_v50 }
  0xac   : > { %v210_v56 = vpop.xlane.xlu1 %209  ;;  %v372_v57 = vmul.f32 %v741_v37, %v371_v54 }
  0xad   : > { %744 = vrsqrt.f32 %v324_v55  ;;  %v224_v61 = vadd.f32 %v210_v56, %v194_v52  ;;  %vm383_vm7 = vweird.f32 %v324_v55 }
  0xae   : > { %v376_v60 = vsel %vm375_vm2, %v741_v37, %v372_v57 }
  0xaf   : > { %v435_v62 = vmul.f32 %v427_v58, %v376_v60  ;;  %v419_v63 = vmul.f32 %v411_v59, %v376_v60  ;;  %v1098_v11 = vmul.f32 0.00390625, %v224_v61 }
  0xb1   : > { %v743_v2 = vpop.eup %742  ;;  %499 = vmatmul.f32.vlgmr.msra.gmra.mxu2 %v435_v62  ;;  %540 = vmatmul.f32.vlgmr.msra.gmra.mxu3 %v419_v63  ;;  %v304_v17 = vmul.f32 %v1098_v11, %v1098_v11 }
  0xb2   : > { %v328_v5 = vmul.f32 %v743_v2, %v319_v50  ;;  %v220_v6 = vpop.xlane.xlu0 %219  ;;  %vm334_vm3 = vweird.f32 %v743_v2 }
  0xb3   : > { %v266_v9 = vpop.xlane.xlu2 %265  ;;  %v745_v10 = vpop.eup %744  ;;  %v229_v0 = vadd.f32 %v220_v6, %v204_v53  ;;  %vm335_vm6 = vmor %vm333_vm4, %vm334_vm3 }
  0xb4   : > { %v378_v15 = vmul.f32 %v745_v10, %v324_v55  ;;  %v242_v18 = vpop.xlane.xlu1 %241  ;;  %v329_v20 = vmul.f32 %v743_v2, %v328_v5  ;;  %vm384_vm5 = vweird.f32 %v745_v10 }
  0xb5   : > { %v280_v24 = vadd.f32 %v266_v9, %v242_v18  ;;  %v1104_v39 = vmul.f32 0.00390625, %v229_v0  ;;  %vm385_vm8 = vmor %vm383_vm7, %vm384_vm5  ;;  %v408_v18 = vsub.f32 %v933_v12, %v1098_v11 }
  0xb6   : > { %v330_v3 = vmul.f32 0.5, %v329_v20  ;;  %v379_v25 = vmul.f32 %v745_v10, %v378_v15  ;;  %v424_v15 = vsub.f32 %v939_v14, %v1098_v11 }
  0xb7   : > { %v296_v26 = vmul.f32 0.00390625, %v280_v24  ;;  %v309_v1 = vmul.f32 %v1104_v39, %v1104_v39 }
  0xb8   : > { %v331_v27 = vsub.f32 1.5, %v330_v3  ;;  %v380_v30 = vmul.f32 0.5, %v379_v25 }
  0xb9   : > { %v312_v31 = vsub.f32 %v296_v26, %v304_v17 }
  0xba   : > { %v252_v33 = vpop.xlane.xlu0 %251  ;;  %v332_v36 = vmul.f32 %v743_v2, %v331_v27  ;;  %v381_v37 = vsub.f32 1.5, %v380_v30 }
  0xbb   : > { %v196_v35 = vpop.xlane.xlu2 %195  ;;  %v320_v40 = vadd.f32 1e-05, %v312_v31 }
  0xbc   : > { %v276_v43 = vpop.xlane.xlu1 %275  ;;  %v336_v44 = vsel %vm335_vm6, %v743_v2, %v332_v36  ;;  %v382_v45 = vmul.f32 %v745_v10, %v381_v37  ;;  %v429_v36 = vsub.f32 %v947_v16, %v1104_v39 }
  0xbd   : > { %746 = vrsqrt.f32 %v320_v40  ;;  %v285_v46 = vadd.f32 %v276_v43, %v252_v33  ;;  %v431_v47 = vmul.f32 %v423_v32, %v336_v44  ;;  %v415_v48 = vmul.f32 %v407_v41, %v336_v44 }
  0xbe   : > { %v386_v49 = vsel %vm385_vm8, %v745_v10, %v382_v45  ;;  %vm343_vm10 = vweird.f32 %v320_v40  ;;  %v413_v41 = vsub.f32 %v936_v13, %v1104_v39 }
  0xbf   : > { %v301_v50 = vmul.f32 0.00390625, %v285_v46  ;;  %487 = vmatmul.f32.vlgmr.msra.gmra.mxu0 %v431_v47  ;;  %528 = vmatmul.f32.vlgmr.msra.gmra.mxu1 %v415_v48  ;;  %v436_v8 = vmul.f32 %v428_v42, %v386_v49  ;;  %v420_v34 = vmul.f32 %v412_v4, %v386_v49 }
  0xc1   : > { %v317_v51 = vsub.f32 %v301_v50, %v309_v1  ;;  %502 = vmatmul.f32.gmra.mxu2 %v436_v8  ;;  %543 = vmatmul.f32.gmra.mxu3 %v420_v34 }
  0xc2   : > { %v212_v52 = vpop.xlane.xlu0 %211 }
  0xc3   : > { %v222_v7 = vpop.xlane.xlu2 %221  ;;  %v747_v38 = vpop.eup %746  ;;  %v325_v53 = vadd.f32 1e-05, %v317_v51  ;;  %v225_v57 = vadd.f32 %v212_v52, %v196_v35 }
  0xc4   : > { %v338_v54 = vmul.f32 %v747_v38, %v320_v40  ;;  %v206_v55 = vpop.xlane.xlu1 %205  ;;  %vm344_vm9 = vweird.f32 %v747_v38 }
  0xc5   : > { %748 = vrsqrt.f32 %v325_v53  ;;  %v1115_v63 = vmul.f32 0.00390625, %v225_v57  ;;  %v230_v9 = vadd.f32 %v222_v7, %v206_v55  ;;  %vm345_vm11 = vmor %vm343_vm10, %vm344_vm9  ;;  %vm393_vm13 = vweird.f32 %v325_v53 }
  0xc6   : > { %v339_v56 = vmul.f32 %v747_v38, %v338_v54 }
  0xc7   : > { %v305_v25 = vmul.f32 %v1115_v63, %v1115_v63  ;;  %v1123_v27 = vmul.f32 0.00390625, %v230_v9  ;;  %v409_v57 = vsub.f32 %v955_v19, %v1115_v63 }
  0xc8   : > { %v340_v58 = vmul.f32 0.5, %v339_v56  ;;  %v425_v56 = vsub.f32 %v961_v21, %v1115_v63 }
  0xc9   : > { %v310_v40 = vmul.f32 %v1123_v27, %v1123_v27  ;;  %v414_v21 = vsub.f32 %v967_v23, %v1123_v27 }
  0xca   : > { %v244_v59 = vpop.xlane.xlu0 %243  ;;  %v341_v61 = vsub.f32 1.5, %v340_v58 }
  0xcb   : > { %v254_v60 = vpop.xlane.xlu2 %253  ;;  %v749_v62 = vpop.eup %748 }
  0xcc   : > { %v388_v2 = vmul.f32 %v749_v62, %v325_v53  ;;  %v268_v5 = vpop.xlane.xlu1 %267  ;;  %v342_v6 = vmul.f32 %v747_v38, %v341_v61  ;;  %vm394_vm12 = vweird.f32 %v749_v62 }
  0xcd   : > { %v281_v10 = vadd.f32 %v268_v5, %v244_v59  ;;  %vm395_vm14 = vmor %vm393_vm13, %vm394_vm12 }
  0xce   : > { %v346_v20 = vsel %vm345_vm11, %v747_v38, %v342_v6  ;;  %v389_v24 = vmul.f32 %v749_v62, %v388_v2  ;;  %v430_v6 = vsub.f32 %v964_v22, %v1123_v27 }
  0xcf   : > { %v297_v3 = vmul.f32 0.00390625, %v281_v10  ;;  %v432_v0 = vmul.f32 %v424_v15, %v346_v20  ;;  %v416_v17 = vmul.f32 %v408_v18, %v346_v20 }
  0xd0   : > { %v390_v26 = vmul.f32 0.5, %v389_v24 }
  0xd1   : > { %v313_v30 = vsub.f32 %v297_v3, %v305_v25  ;;  %490 = vmatmul.f32.gmra.mxu0 %v432_v0  ;;  %531 = vmatmul.f32.gmra.mxu1 %v416_v17  ;;  %v739_v17 = vld [vmem:[%s1193_s2] ss:$0 sm:$0xff] }
  0xd2   : > { %v278_v31 = vpop.xlane.xlu0 %277  ;;  %v391_v32 = vsub.f32 1.5, %v390_v26 }
  0xd3   : > { %v321_v14 = vadd.f32 1e-05, %v313_v30  ;;  %v286_v33 = vadd.f32 %v278_v31, %v254_v60  ;;  %v214_v11 = vpop.xlane.xlu2 %213 }
  0xd4   : > { %v198_v12 = vpop.xlane.xlu1 %197  ;;  %v392_v35 = vmul.f32 %v749_v62, %v391_v32 }
  0xd5   : > { %750 = vrsqrt.f32 %v321_v14  ;;  %v302_v37 = vmul.f32 0.00390625, %v286_v33  ;;  %v226_v44 = vadd.f32 %v214_v11, %v198_v12  ;;  %vm353_vm0 = vweird.f32 %v321_v14 }
  0xd6   : > { %v396_v42 = vsel %vm395_vm14, %v749_v62, %v392_v35 }
  0xd7   : > { %v318_v43 = vsub.f32 %v302_v37, %v310_v40  ;;  %v437_v45 = vmul.f32 %v429_v36, %v396_v42  ;;  %v421_v4 = vmul.f32 %v413_v41, %v396_v42  ;;  %v290_v16 = vmul.f32 0.00390625, %v226_v44 }
  0xd9   : > { %v326_v46 = vadd.f32 1e-05, %v318_v43  ;;  %505 = vmatmul.f32.gmra.mxu2 %v437_v45  ;;  %546 = vmatmul.f32.gmra.mxu3 %v421_v4  ;;  %v306_v51 = vmul.f32 %v290_v16, %v290_v16  ;;  %v426_v22 = vsub.f32 %v981_v28, %v290_v16  ;;  %v410_v3 = vsub.f32 %v984_v29, %v290_v16 }
  0xda   : > { %v246_v47 = vpop.xlane.xlu0 %245 }
  0xdb   : > { %v751_v48 = vpop.eup %750  ;;  %752 = vrsqrt.f32 %v326_v46  ;;  %vm403_vm3 = vweird.f32 %v326_v46 }
  0xdc   : > { %v348_v49 = vmul.f32 %v751_v48, %v321_v14  ;;  %v270_v50 = vpop.xlane.xlu1 %269  ;;  %vm354_vm15 = vweird.f32 %v751_v48 }
  0xdd   : > { %v282_v1 = vadd.f32 %v270_v50, %v246_v47  ;;  %vm355_vm1 = vmor %vm353_vm0, %vm354_vm15 }
  0xde   : > { %v349_v8 = vmul.f32 %v751_v48, %v348_v49 }
  0xdf   : > { %v298_v34 = vmul.f32 0.00390625, %v282_v1 }
  0xe0   : > { %v350_v52 = vmul.f32 0.5, %v349_v8 }
  0xe1   : > { %v753_v13 = vpop.eup %752  ;;  %v314_v39 = vsub.f32 %v298_v34, %v306_v51 }
  0xe2   : > { %v398_v7 = vmul.f32 %v753_v13, %v326_v46  ;;  %v351_v38 = vsub.f32 1.5, %v350_v52  ;;  %vm404_vm2 = vweird.f32 %v753_v13 }
  0xe3   : > { %v322_v53 = vadd.f32 1e-05, %v314_v39  ;;  %vm405_vm4 = vmor %vm403_vm3, %vm404_vm2 }
  0xe4   : > { %v352_v54 = vmul.f32 %v751_v48, %v351_v38  ;;  %v399_v55 = vmul.f32 %v753_v13, %v398_v7 }
  0xe5   : > { %754 = vrsqrt.f32 %v322_v53  ;;  %vm363_vm6 = vweird.f32 %v322_v53 }
  0xe6   : > { %v356_v58 = vsel %vm355_vm1, %v751_v48, %v352_v54  ;;  %v400_v59 = vmul.f32 0.5, %v399_v55 }
  0xe7   : > { %v433_v60 = vmul.f32 %v425_v56, %v356_v58  ;;  %v417_v61 = vmul.f32 %v409_v57, %v356_v58 }
  0xe8   : > { %v401_v62 = vsub.f32 1.5, %v400_v59 }
  0xe9   : > { %493 = vmatmul.f32.gmra.mxu0 %v433_v60  ;;  %534 = vmatmul.f32.gmra.mxu1 %v417_v61 }
  0xea   : > { %v402_v2 = vmul.f32 %v753_v13, %v401_v62 }
  0xeb   : > { %v755_v5 = vpop.eup %754 }
  0xec   : > { %v358_v9 = vmul.f32 %v755_v5, %v322_v53  ;;  %v406_v19 = vsel %vm405_vm4, %v753_v13, %v402_v2  ;;  %vm364_vm5 = vweird.f32 %v755_v5 }
  0xed   : > { %v438_v63 = vmul.f32 %v430_v6, %v406_v19  ;;  %v422_v10 = vmul.f32 %v414_v21, %v406_v19  ;;  %vm365_vm7 = vmor %vm363_vm6, %vm364_vm5 }
  0xee   : > { %v359_v15 = vmul.f32 %v755_v5, %v358_v9 }
  0xef   : > { %508 = vmatmul.f32.gmra.mxu2 %v438_v63  ;;  %549 = vmatmul.f32.gmra.mxu3 %v422_v10 }
  0xf0   : > { %v360_v18 = vmul.f32 0.5, %v359_v15 }
  0xf2   : > { %v361_v20 = vsub.f32 1.5, %v360_v18 }
  0xf4   : > { %v362_v24 = vmul.f32 %v755_v5, %v361_v20 }
  0xf6   : > { %v366_v23 = vsel %vm365_vm7, %v755_v5, %v362_v24 }
  0xf7   : > { %v434_v25 = vmul.f32 %v426_v22, %v366_v23  ;;  %v418_v0 = vmul.f32 %v410_v3, %v366_v23 }
  0xf9   : > { %496 = vmatmul.f32.gmra.mxu0 %v434_v25  ;;  %537 = vmatmul.f32.gmra.mxu1 %v418_v0 }
 0x134   : > { %v500_v26 = vpop.f32.mrf.mxu2  ;;  %v541_v27 = vpop.f32.mrf.mxu3 }
 0x135   : > { %v542_v30 = vadd.f32 %v541_v27, %v500_v26 }
 0x137   : > { %v561_v31 = vadd.f32 %v739_v17, %v542_v30 }
 0x139   : > { %569 = vst [vmem:[%s1147_s25 + $0x20] sm:$0xff] %v561_v31 }
 0x13c   : > { %v488_v28 = vpop.f32.mrf.mxu0  ;;  %v529_v29 = vpop.f32.mrf.mxu1 }
 0x13d   : > { %v530_v32 = vadd.f32 %v529_v29, %v488_v28 }
 0x13f   : > { %v557_v14 = vadd.f32 %v739_v17, %v530_v32 }
 0x141   : > { %565 = vst [vmem:[%s1147_s25] sm:$0xff] %v557_v14 }
 0x144   : > { %v503_v33 = vpop.f32.mrf.mxu2  ;;  %v544_v12 = vpop.f32.mrf.mxu3 }
 0x145   : > { %v545_v11 = vadd.f32 %v544_v12, %v503_v33 }
 0x147   : > { %v562_v35 = vadd.f32 %v739_v17, %v545_v11 }
 0x149   : > { %570 = vst [vmem:[%s1147_s25 + $0x28] sm:$0xff] %v562_v35 }
 0x14e   : > { %v491_v36 = vpop.f32.mrf.mxu0  ;;  %v532_v37 = vpop.f32.mrf.mxu1 }
 0x14f   : > { %v533_v40 = vadd.f32 %v532_v37, %v491_v36 }
 0x151   : > { %v558_v41 = vadd.f32 %v739_v17, %v533_v40 }
 0x153   : > { %566 = vst [vmem:[%s1147_s25 + $0x8] sm:$0xff] %v558_v41 }
 0x15c   : > { %v506_v42 = vpop.f32.mrf.mxu2  ;;  %v547_v43 = vpop.f32.mrf.mxu3 }
 0x15d   : > { %v548_v44 = vadd.f32 %v547_v43, %v506_v42 }
 0x15f   : > { %v563_v45 = vadd.f32 %v739_v17, %v548_v44 }
 0x161   : > { %571 = vst [vmem:[%s1147_s25 + $0x30] sm:$0xff] %v563_v45 }
 0x166   : > { %v494_v4 = vpop.f32.mrf.mxu0  ;;  %v535_v46 = vpop.f32.mrf.mxu1 }
 0x167   : > { %v536_v47 = vadd.f32 %v535_v46, %v494_v4 }
 0x169   : > { %v559_v48 = vadd.f32 %v739_v17, %v536_v47 }
 0x16b   : > { %567 = vst [vmem:[%s1147_s25 + $0x10] sm:$0xff] %v559_v48 }
 0x172   : > { %v509_v16 = vpop.f32.mrf.mxu2  ;;  %v550_v49 = vpop.f32.mrf.mxu3 }
 0x173   : > { %v551_v50 = vadd.f32 %v550_v49, %v509_v16 }
 0x175   : > { %v564_v1 = vadd.f32 %v739_v17, %v551_v50 }
 0x176   : > { %v497_v8 = vpop.f32.mrf.mxu0  ;;  %v538_v34 = vpop.f32.mrf.mxu1 }
 0x177   : > { %572 = vst [vmem:[%s1147_s25 + $0x38] sm:$0xff] %v564_v1  ;;  %v539_v51 = vadd.f32 %v538_v34, %v497_v8 }
 0x179   : > { %v560_v52 = vadd.f32 %v739_v17, %v539_v51 }
 0x17b   : > { %568 = vst [vmem:[%s1147_s25 + $0x18] sm:$0xff] %v560_v52 }
 0x17c   : > { %783 = shalt.err (!%p780_p3)
}
 0x17d   : > { %s820_s17 = smov 128   ;;  %s821_s19 = smov 8  }
 0x17e   : > { %698 = dma.vmem_to_hbm [thread:$0]  (%p880_p5), %s587_s30, 1024, %s589_s4, %s574_s16, %s820_s17, %s820_s17, %s821_s19  }
 0x17f PF: > { %p704_p4 = scmp.ge.s32.totalorder %s818_s15, 2  ;;  %s603_s20 = sand.u32 1, %s806_s12  }
 0x180   : > { %s604_s24 = scalar_lea.sflag [#allocation3], %s603_s20 }
 0x181   : > { %p701_p7 = pnand %p704_p4, %p884_p6 }
 0x183   : > { %p702_p8 = pneg %p701_p7 }
 0x185   : > { %801 = dma.done.wait (%p702_p8), %s604_s24, 1024  }
 0x186   : > { %803 = vsyncadd (%p702_p8), %s604_s24, 4294966272  ;;  %p13_p9 = scmp.ge.s32.totalorder %s867_s18, 4   ;;  %s1197_s12 = smov %s810_s13 }
 0x187   : > { %s1198_s13 = smov %s814_s14  ;;  %s1199_s14 = smov %s878_s21 }
 0x188   : > { %s1200_s15 = smov %s867_s18  ;;  %15 = sbr.rel (!%p13_p9) target bundleno = 3 (0x3), region = 67 }
 0x18d   :  { %610 = vsyncpa [#allocation3], 1 }
 0x18e   :  { %612 = vsyncpa [#allocation3 + $0x1], 1 }

</bundles_post_ra>
